<compile_context>
chip_gen: v7x
topology: tpu7x:2x2x1
jax: 0.10.0
libtpu: 0.0.40
codegen_flags: <defaults>
</compile_context>

<pallas_src>
import math
import numpy as np
import jax
import jax.numpy as jnp
from jax.experimental import pallas as pl
from jax.experimental.pallas import tpu as pltpu


# --------------------------------------------------------------------------
# Filter construction (mirrors Resample._indices_and_weights, done in numpy)
# --------------------------------------------------------------------------
def _indices_and_weights(orig_freq, new_freq, lowpass_filter_width, output_samples):
    min_freq = min(orig_freq, new_freq)
    lowpass_cutoff = 0.99 * 0.5 * min_freq
    assert lowpass_cutoff * 2 <= min_freq
    window_width = lowpass_filter_width / (2.0 * lowpass_cutoff)

    output_t = np.arange(output_samples, dtype=np.float64) / float(new_freq)
    min_t = output_t - window_width
    max_t = output_t + window_width
    min_input_index = np.ceil(min_t * orig_freq)
    max_input_index = np.floor(max_t * orig_freq)
    num_indices = max_input_index - min_input_index + 1
    max_weight_width = int(num_indices.max())

    j = np.arange(max_weight_width, dtype=np.float64)
    input_index = min_input_index[:, None] + j[None, :]
    delta_t = input_index / orig_freq - output_t[:, None]

    weights = np.zeros_like(delta_t)
    inside = np.abs(delta_t) < window_width
    weights[inside] = 0.5 * (
        1.0 + np.cos(2.0 * math.pi * lowpass_cutoff / lowpass_filter_width * delta_t[inside])
    )
    t_eq_zero = delta_t == 0.0
    t_ne_zero = ~t_eq_zero
    weights[t_ne_zero] *= np.sin(2.0 * math.pi * lowpass_cutoff * delta_t[t_ne_zero]) / (
        math.pi * delta_t[t_ne_zero]
    )
    weights[t_eq_zero] *= 2.0 * lowpass_cutoff
    weights /= float(orig_freq)

    first_indices = min_input_index.astype(np.int64)
    return first_indices, weights.astype(np.float32)


def _num_output_samples(input_num_samp, orig_freq, new_freq):
    samp_in = int(orig_freq)
    samp_out = int(new_freq)
    tick_freq = abs(samp_in * samp_out) // math.gcd(samp_in, samp_out)
    ticks_per_input_period = tick_freq // samp_in
    interval_length = input_num_samp * ticks_per_input_period
    if interval_length <= 0:
        return 0
    ticks_per_output_period = tick_freq // samp_out
    last_output_samp = interval_length // ticks_per_output_period
    if last_output_samp * ticks_per_output_period == interval_length:
        last_output_samp -= 1
    return int(last_output_samp + 1)


def _group_size(conv_stride, output_samples):
    """Smallest G such that both G*conv_stride and G*output_samples are % 128 == 0."""
    g_s = 128 // math.gcd(conv_stride, 128)
    g_n = 128 // math.gcd(output_samples, 128)
    return (g_s * g_n) // math.gcd(g_s, g_n)


def _round_up(x, m):
    return -(-x // m) * m


# --------------------------------------------------------------------------
# Pallas kernels
# --------------------------------------------------------------------------
def _grouped_resample_kernel(lo_ref, hi_ref, w_lo_ref, w_hi_ref, out_ref):
    # One M-tile of the flattened (rows*groups) dimension against the
    # block-Toeplitz polyphase bank.  Both matmuls are lane-dense:
    #   lo: [tile_m, S]            @ [S, N]
    #   hi: [tile_m, overlap_pad]  @ [overlap_pad, N]   (carries the small
    #       inter-group overlap; weight rows past the true tail are zero)
    acc = jnp.dot(lo_ref[...], w_lo_ref[...], preferred_element_type=jnp.float32)
    acc = acc + jnp.dot(hi_ref[...], w_hi_ref[...], preferred_element_type=jnp.float32)
    out_ref[...] = acc.astype(out_ref.dtype)


def _pick_tile_m(M, S, Kh, N, vmem_target=24 * 1024 * 1024):
    """Largest row tile (multiple of 8, capped at 512) whose double-buffered
    working set plus the resident weights fits the VMEM target."""
    weight_bytes = 2 * (S + Kh) * N * 4          # double-buffered weights
    per_row_bytes = 2 * (S + Kh + N) * 4         # double-buffered lo+hi+out
    avail = max(vmem_target - weight_bytes, 8 * per_row_bytes)
    tile = int(min(512, avail // per_row_bytes))
    tile = max(8, (tile // 8) * 8)
    m8 = _round_up(M, 8)
    return m8 if m8 <= tile else tile


def _pallas_grouped_resample(lo, hi, w_lo, w_hi, tile_m):
    M, S = lo.shape
    Kh = hi.shape[1]
    N = w_lo.shape[1]
    grid = (M // tile_m,)
    return pl.pallas_call(
        _grouped_resample_kernel,
        out_shape=jax.ShapeDtypeStruct((M, N), jnp.float32),
        grid=grid,
        in_specs=[
            pl.BlockSpec((tile_m, S), lambda i: (i, 0)),    # lo slab tile
            pl.BlockSpec((tile_m, Kh), lambda i: (i, 0)),   # narrow overlap tile
            pl.BlockSpec((S, N), lambda i: (0, 0)),         # constant weights
            pl.BlockSpec((Kh, N), lambda i: (0, 0)),
        ],
        out_specs=pl.BlockSpec((tile_m, N), lambda i: (i, 0)),
        compiler_params=pltpu.CompilerParams(
            # Single many-iteration axis -> megacore sharding on v7x.
            dimension_semantics=("parallel",),
            vmem_limit_bytes=32 * 1024 * 1024,
        ),
    )(lo, hi, w_lo, w_hi)


def _frames_matmul_kernel(frames_ref, wbig_ref, out_ref):
    out_ref[...] = jnp.dot(
        frames_ref[...], wbig_ref[...], preferred_element_type=jnp.float32
    ).astype(out_ref.dtype)


def _pallas_frames_matmul(frames, wbig, tile_m=512):
    """Fallback path (exotic rate ratios): frames [M, K] @ wbig [K, N].
    # TODO(synk): fallback keeps the JAX-side frames gather and a non-128
    # output width; exotic ratios could be grouped like the main path."""
    M, K = frames.shape
    _, N = wbig.shape
    tile_m = min(tile_m, _round_up(M, 8))
    m_pad = _round_up(M, tile_m)
    if m_pad != M:
        frames = jnp.pad(frames, ((0, m_pad - M), (0, 0)))
    out = pl.pallas_call(
        _frames_matmul_kernel,
        out_shape=jax.ShapeDtypeStruct((m_pad, N), jnp.float32),
        grid=(m_pad // tile_m,),
        in_specs=[
            pl.BlockSpec((tile_m, K), lambda i: (i, 0)),
            pl.BlockSpec((K, N), lambda i: (0, 0)),
        ],
        out_specs=pl.BlockSpec((tile_m, N), lambda i: (i, 0)),
        compiler_params=pltpu.CompilerParams(
            dimension_semantics=("parallel",),
            vmem_limit_bytes=32 * 1024 * 1024,
        ),
    )(frames, wbig)
    return out[:M]


# --------------------------------------------------------------------------
# Module wrapper (forward-pass semantics of utils/augment.py::Resample)
# --------------------------------------------------------------------------
class ResamplePallas:
    _WEIGHT_BUDGET_BYTES = 8 * 1024 * 1024   # cap on (S+overlap)*N*4 weight bank

    def __init__(self, orig_freq=16000, new_freq=16000, lowpass_filter_width=6):
        self.orig_freq = int(orig_freq)
        self.new_freq = int(new_freq)
        self.lowpass_filter_width = int(lowpass_filter_width)

        base_freq = math.gcd(self.orig_freq, self.new_freq)
        self.conv_stride = self.orig_freq // base_freq
        self.output_samples = self.new_freq // base_freq
        self.conv_transpose_stride = self.output_samples
        assert self.orig_freq % self.conv_stride == 0
        assert self.new_freq % self.conv_transpose_stride == 0

        if self.orig_freq == self.new_freq:
            return

        self.first_indices, self.weights = _indices_and_weights(
            self.orig_freq, self.new_freq, self.lowpass_filter_width,
            self.output_samples,
        )
        self._min_first = int(self.first_indices.min())
        off = (self.first_indices - self._min_first).astype(np.int64)
        self._off = off
        W = self.weights.shape[1]
        self._frame_len = int(off.max()) + W

        cs, os_ = self.conv_stride, self.output_samples
        G = _group_size(cs, os_)
        S, N = G * cs, G * os_
        tail = self._frame_len - cs
        overlap_pad = 128 * max(1, _round_up(max(tail, 1), 128) // 128)
        weight_bytes = (S + overlap_pad) * N * 4
        self._use_grouped = (overlap_pad <= S) and (weight_bytes <= self._WEIGHT_BUDGET_BYTES)

        if self._use_grouped:
            self._G, self._S, self._N = G, S, N
            self._overlap_pad = overlap_pad
            # Block-Toeplitz polyphase bank over S + overlap_pad contraction rows:
            #   w_full[r*cs + off[i] + j, r*os + i] = weights[i, j]
            w_full = np.zeros((S + overlap_pad, N), dtype=np.float32)
            for r in range(G):
                for i in range(os_):
                    row0 = r * cs + int(off[i])
                    w_full[row0:row0 + W, r * os_ + i] = self.weights[i]
            self._w_lo = jnp.asarray(w_full[:S])                 # [S, N]
            self._w_hi = jnp.asarray(w_full[S:S + overlap_pad])  # [overlap_pad, N]
        else:
            # Exotic ratios where grouped weights would be too large: fall back
            # to the gather + matmul formulation (correct, less efficient).
            wbig = np.zeros((self._frame_len, os_), dtype=np.float32)
            for i in range(os_):
                wbig[int(off[i]):int(off[i]) + W, i] = self.weights[i]
            self._wbig = jnp.asarray(wbig)

    # ------------------------------------------------------------------
    def __call__(self, waveforms):
        if self.orig_freq == self.new_freq:
            return waveforms

        unsqueezed = False
        if waveforms.ndim == 2:                       # [B, T] -> [B, 1, T]
            wav = waveforms[:, None, :]
            unsqueezed = True
        elif waveforms.ndim == 3:                     # [B, T, C] -> [B, C, T]
            wav = jnp.transpose(waveforms, (0, 2, 1))
        else:
            raise ValueError("Input must be 2 or 3 dimensions")

        B, C, T = wav.shape
        flat = wav.reshape(B * C, T).astype(jnp.float32)
        tot_out = _num_output_samples(T, self.orig_freq, self.new_freq)

        if tot_out == 0:                              # zero-extent grid guard
            empty = jnp.zeros((B, C, 0), dtype=jnp.float32)
            return empty[:, 0, :] if unsqueezed else jnp.transpose(empty, (0, 2, 1))

        num_blocks = (tot_out - 1) // self.output_samples + 1
        if self._use_grouped:
            out = self._resample_grouped(flat, num_blocks)
        else:
            out = self._resample_fallback(flat, num_blocks)

        out = out[:, :tot_out].reshape(B, C, tot_out)
        if unsqueezed:
            return out[:, 0, :]                       # [B, T_out]
        return jnp.transpose(out, (0, 2, 1))          # [B, T_out, C]

    # ------------------------------------------------------------------
    def _pad_waveform(self, flat, needed_len):
        """Shift by min_first and zero-pad to exactly needed_len samples."""
        _, T = flat.shape
        left_pad = max(0, -self._min_first)
        start = max(0, self._min_first)
        avail = left_pad + (T - start)
        right_pad = max(0, needed_len - avail)
        padded = jnp.pad(flat[:, start:], ((0, 0), (left_pad, right_pad)))
        return padded[:, :needed_len]

    def _resample_grouped(self, flat, num_blocks):
        R = flat.shape[0]
        S, N, G, Kh = self._S, self._N, self._G, self._overlap_pad
        num_groups = _round_up(num_blocks, G) // G
        padded = self._pad_waveform(flat, (num_groups + 1) * S)
        padded3 = padded.reshape(R, num_groups + 1, S)

        # Flatten (row, group) into the matmul M dimension so the MXU is fully
        # fed even for small batch*channels.  lo is a contiguous reshape of the
        # padded waveform; hi is the small 128-wide overlap slab.
        M = R * num_groups
        lo = padded3[:, :num_groups, :].reshape(M, S)
        hi = padded3[:, 1:, :Kh].reshape(M, Kh)

        tile_m = _pick_tile_m(M, S, Kh, N)
        m_pad = _round_up(M, tile_m)
        if m_pad != M:
            lo = jnp.pad(lo, ((0, m_pad - M), (0, 0)))
            hi = jnp.pad(hi, ((0, m_pad - M), (0, 0)))

        out = _pallas_grouped_resample(lo, hi, self._w_lo, self._w_hi, tile_m)
        return out[:M].reshape(R, num_groups * N)

    def _resample_fallback(self, flat, num_blocks):
        R = flat.shape[0]
        needed_len = (num_blocks - 1) * self.conv_stride + self._frame_len
        padded = self._pad_waveform(flat, needed_len)
        blk_idx = (np.arange(num_blocks) * self.conv_stride)[:, None] + \
                  np.arange(self._frame_len)[None, :]
        frames = padded[:, blk_idx].reshape(R * num_blocks, self._frame_len)
        out = _pallas_frames_matmul(frames, self._wbig)
        return out.reshape(R, num_blocks * self.output_samples)


# --------------------------------------------------------------------------
if __name__ == "__main__":
    key = jax.random.PRNGKey(0)

    def numpy_reference(xn, res, tot_out):
        """float64 dense reference following the kaldi formula."""
        fi = res.first_indices
        w = res.weights.astype(np.float64)
        os_, st = res.output_samples, res.conv_stride
        Bn, Tn = xn.shape
        Wn = w.shape[1]
        x64 = xn.astype(np.float64)
        ref = np.zeros((Bn, tot_out), dtype=np.float64)
        jj = np.arange(Wn)
        for t in range(tot_out):
            i, k = t % os_, t // os_
            idx = int(fi[i]) + k * st + jj
            valid = (idx >= 0) & (idx < Tn)
            if valid.any():
                ref[:, t] = x64[:, idx[valid]] @ w[i, valid]
        return ref

    # ---- grouped path (16k -> 12k): single group, multi-group, multi-M-tile
    orig_freq, new_freq = 16000, 12000
    resampler = ResamplePallas(orig_freq=orig_freq, new_freq=new_freq,
                               lowpass_filter_width=6)
    assert resampler._use_grouped
    for (B, T) in [(2, 64), (2, 600), (64, 5000)]:
        x = jax.random.normal(jax.random.fold_in(key, T), (B, T), dtype=jnp.float32)
        y = jax.block_until_ready(resampler(x))
        tot_out = _num_output_samples(T, orig_freq, new_freq)
        ref = numpy_reference(np.asarray(x), resampler, tot_out)
        assert y.shape == (B, tot_out), (y.shape, (B, tot_out))
        assert np.allclose(np.asarray(y), ref, rtol=1e-4, atol=1e-5), \
            float(np.abs(np.asarray(y) - ref).max())

    # ---- 3-D [batch, time, channels] path: shape + per-channel consistency
    B, T, C = 2, 64, 2
    x3 = jax.random.normal(jax.random.fold_in(key, 999), (B, T, C), dtype=jnp.float32)
    y3 = jax.block_until_ready(resampler(x3))
    tot_out = _num_output_samples(T, orig_freq, new_freq)
    assert y3.shape == (B, tot_out, C), y3.shape
    y_c0 = jax.block_until_ready(resampler(x3[:, :, 0]))
    assert np.allclose(np.asarray(y3[:, :, 0]), np.asarray(y_c0),
                       rtol=1e-5, atol=1e-6)

    # ---- fallback path (exotic ratio 16k -> 22.05k: grouped weights too big)
    fb = ResamplePallas(orig_freq=16000, new_freq=22050, lowpass_filter_width=6)
    assert not fb._use_grouped
    Bf, Tf = 2, 300
    xf = jax.random.normal(jax.random.fold_in(key, 4242), (Bf, Tf), dtype=jnp.float32)
    yf = jax.block_until_ready(fb(xf))
    tot_out_f = _num_output_samples(Tf, 16000, 22050)
    ref_f = numpy_reference(np.asarray(xf), fb, tot_out_f)
    assert yf.shape == (Bf, tot_out_f), (yf.shape, (Bf, tot_out_f))
    assert np.allclose(np.asarray(yf), ref_f, rtol=1e-4, atol=1e-5), \
        float(np.abs(np.asarray(yf) - ref_f).max())

    print("KERNEL_OK")
</pallas_src>

<mosaic_0001>
module attributes {stable_mosaic.version = 11 : i64} {
  func.func @_grouped_resample_kernel(%arg0: i32, %arg1: memref<8x512xf32, #tpu.memory_space<vmem>>, %arg2: memref<8x128xf32, #tpu.memory_space<vmem>>, %arg3: memref<512x384xf32, #tpu.memory_space<vmem>>, %arg4: memref<128x384xf32, #tpu.memory_space<vmem>>, %arg5: memref<8x384xf32, #tpu.memory_space<vmem>>) attributes {dimension_semantics = [#tpu.dimension_semantics<parallel>], iteration_bounds = array<i64: 1>, scalar_prefetch = 0 : i64, scratch_operands = 0 : i64, tpu.core_type = #tpu.core_type<tc>, window_params = [{transform_indices = @transform_0, window_bounds = array<i64: 8, 512>}, {transform_indices = @transform_1, window_bounds = array<i64: 8, 128>}, {pipeline_mode = #tpu.pipeline_mode<synchronous>, transform_indices = @transform_2, window_bounds = array<i64: 512, 384>}, {pipeline_mode = #tpu.pipeline_mode<synchronous>, transform_indices = @transform_3, window_bounds = array<i64: 128, 384>}, {transform_indices = @transform_4, window_bounds = array<i64: 8, 384>}]} {
    %c0 = arith.constant 0 : index
    %c0_0 = arith.constant 0 : index
    %0 = vector.load %arg1[%c0, %c0_0] : memref<8x512xf32, #tpu.memory_space<vmem>>, vector<8x512xf32>
    %c0_1 = arith.constant 0 : index
    %c0_2 = arith.constant 0 : index
    %1 = vector.load %arg3[%c0_1, %c0_2] : memref<512x384xf32, #tpu.memory_space<vmem>>, vector<512x384xf32>
    %cst = arith.constant dense<0.000000e+00> : vector<8x384xf32>
    %2 = tpu.matmul %0, %1, %cst {dimension_numbers = #tpu.dot_dimension_numbers<[1], [0], [0], [1], [0, 0, 1, 1], [], []>} : vector<8x512xf32>, vector<512x384xf32>, vector<8x384xf32> -> vector<8x384xf32>
    %c0_3 = arith.constant 0 : index
    %c0_4 = arith.constant 0 : index
    %3 = vector.load %arg2[%c0_3, %c0_4] : memref<8x128xf32, #tpu.memory_space<vmem>>, vector<8x128xf32>
    %c0_5 = arith.constant 0 : index
    %c0_6 = arith.constant 0 : index
    %4 = vector.load %arg4[%c0_5, %c0_6] : memref<128x384xf32, #tpu.memory_space<vmem>>, vector<128x384xf32>
    %cst_7 = arith.constant dense<0.000000e+00> : vector<8x384xf32>
    %5 = tpu.matmul %3, %4, %cst_7 {dimension_numbers = #tpu.dot_dimension_numbers<[1], [0], [0], [1], [0, 0, 1, 1], [], []>} : vector<8x128xf32>, vector<128x384xf32>, vector<8x384xf32> -> vector<8x384xf32>
    %6 = arith.addf %2, %5 : vector<8x384xf32>
    %c0_8 = arith.constant 0 : index
    %c0_9 = arith.constant 0 : index
    %7 = vector.load %arg5[%c0_8, %c0_9] : memref<8x384xf32, #tpu.memory_space<vmem>>, vector<8x384xf32>
    tpu.vector_store %arg5[%c0_8, %c0_9], %6 {strides = array<i32>} : memref<8x384xf32, #tpu.memory_space<vmem>>, vector<8x384xf32>,
    return
  }
  func.func @transform_0(%arg0: i32) -> (i32, i32) {
    %c0_i32 = arith.constant 0 : i32
    %c0_i32_0 = arith.constant 0 : i32
    return %arg0, %c0_i32 : i32, i32
  }
  func.func @transform_1(%arg0: i32) -> (i32, i32) {
    %c0_i32 = arith.constant 0 : i32
    %c0_i32_0 = arith.constant 0 : i32
    return %arg0, %c0_i32 : i32, i32
  }
  func.func @transform_2(%arg0: i32) -> (i32, i32) {
    %c0_i32 = arith.constant 0 : i32
    %c0_i32_0 = arith.constant 0 : i32
    %c0_i32_1 = arith.constant 0 : i32
    return %c0_i32, %c0_i32_0 : i32, i32
  }
  func.func @transform_3(%arg0: i32) -> (i32, i32) {
    %c0_i32 = arith.constant 0 : i32
    %c0_i32_0 = arith.constant 0 : i32
    %c0_i32_1 = arith.constant 0 : i32
    return %c0_i32, %c0_i32_0 : i32, i32
  }
  func.func @transform_4(%arg0: i32) -> (i32, i32) {
    %c0_i32 = arith.constant 0 : i32
    %c0_i32_0 = arith.constant 0 : i32
    return %arg0, %c0_i32 : i32, i32
  }
}

</mosaic_0001>

<bundles_post_ra>
// kernel: tpu_custom_call.1
= control target key start
LH: loop header
LB: loop body
LE: loop exit
PB: predicated region body
PF: predicated region fallthrough
CT: control target
= control target key end

     0   :  { %9 = vsyncpa [#allocation3], 0  ;;  %s1380_s0 = inlined_call_operand.hbm [shape: f32[8,512], index: 0, kind: input, shape index: {}]   ;;  %s1381_s1 = inlined_call_operand.hbm [shape: f32[8,128], index: 1, kind: input, shape index: {}]   ;;  %s1382_s2 = inlined_call_operand.hbm [shape: f32[512,384], index: 2, kind: input, shape index: {}]   ;;  %s1383_s3 = inlined_call_operand.hbm [shape: f32[128,384], index: 3, kind: input, shape index: {}]   ;;  %s1384_s4 = inlined_call_operand.hbm [shape: f32[8,384], index: 4, kind: output, shape index: {}]  }
   0x1   :  { %10 = vsyncpa [#allocation6], 0 }
   0x2   :  { %11 = vsyncpa [#allocation9], 0 }
   0x3   :  { %12 = vsyncpa [#allocation4], 0  ;;  %s1259_s15 = smov [#allocation5]   ;;  %s1260_s17 = smov [#allocation2]  }
   0x4   :  { %s29_s16 = sshll.u32 %s1259_s15, 4  ;;  %s19_s18 = sshll.u32 %s1260_s17, 4  ;;  %s30_s16 = int_to_ptr.vmem [resolvable:$true] %s29_s16  ;;  %s20_s18 = int_to_ptr.vmem [resolvable:$true] %s19_s18 }
   0x5   :  { %s1141_s21 = scalar_lea.hbm %s1381_s1, 128 }
   0x6   :  { %p1142_p0 = scmp.ne.s32.totalorder %s1381_s1, %s1141_s21  ;;  %p1145_p1 = scmp.lt.u32.totalorder %s1141_s21, %s1381_s1 }
   0x8   :  { %p1147_p2 = pnand %p1145_p1, %p1142_p0 }
   0xa   :  { %1150 = shalt.err (!%p1147_p2)
}
   0xb   :  { %s1151_s26 = scalar_lea.vmem %s30_s16, 128  ;;  %p1156_p4 = scmp.lt.s32.totalorder %s30_s16, %s30_s16 }
   0xc   :  { %p1152_p3 = scmp.ne.s32.totalorder %s30_s16, %s1151_s26  ;;  %p1157_p5 = scmp.lt.s32.totalorder %s1151_s26, %s1151_s26 }
   0xe   :  { %p1158_p6 = por %p1157_p5, %p1156_p4 }
  0x10   :  { %p1159_p7 = pnand %p1158_p6, %p1152_p3 }
  0x12   :  { %1162 = shalt.err (!%p1159_p7)
}
  0x13   :  { %32 = dma.hbm_to_vmem [thread:$0]  %s1381_s1, 128, %s30_s16, [#allocation6]  }
  0x14   :  { %s1163_s5 = scalar_lea.hbm %s1380_s0, 512 }
  0x15   :  { %p1164_p8 = scmp.ne.s32.totalorder %s1380_s0, %s1163_s5  ;;  %p1167_p9 = scmp.lt.u32.totalorder %s1163_s5, %s1380_s0 }
  0x17   :  { %p1169_p10 = pnand %p1167_p9, %p1164_p8 }
  0x19   :  { %1172 = shalt.err (!%p1169_p10)
}
  0x1a   :  { %s1173_s10 = scalar_lea.vmem %s20_s18, 512  ;;  %p1178_p12 = scmp.lt.s32.totalorder %s20_s18, %s20_s18 }
  0x1b   :  { %p1174_p11 = scmp.ne.s32.totalorder %s20_s18, %s1173_s10  ;;  %p1179_p13 = scmp.lt.s32.totalorder %s1173_s10, %s1173_s10 }
  0x1d   :  { %p1180_p0 = por %p1179_p13, %p1178_p12 }
  0x1f   :  { %p1181_p1 = pnand %p1180_p0, %p1174_p11 }
  0x21   :  { %1184 = shalt.err (!%p1181_p1)
}
  0x22   :  { %22 = dma.hbm_to_vmem [thread:$0]  %s1380_s0, 512, %s20_s18, [#allocation3]  }
  0x23   :  { %s1261_s12 = smov [#allocation7]   ;;  %s1185_s16 = scalar_lea.hbm %s1382_s2, 24576 }
  0x24   :  { %s38_s13 = sshll.u32 %s1261_s12, 4  ;;  %p1186_p2 = scmp.ne.s32.totalorder %s1382_s2, %s1185_s16  ;;  %s39_s13 = int_to_ptr.vmem [resolvable:$true] %s38_s13 }
  0x25   :  { %p1189_p3 = scmp.lt.u32.totalorder %s1185_s16, %s1382_s2 }
  0x27   :  { %p1191_p4 = pnand %p1189_p3, %p1186_p2 }
  0x29   :  { %1194 = shalt.err (!%p1191_p4)
}
  0x2a   :  { %s1195_s22 = scalar_lea.vmem %s39_s13, 24576  ;;  %p1200_p6 = scmp.lt.s32.totalorder %s39_s13, %s39_s13 }
  0x2b   :  { %p1196_p5 = scmp.ne.s32.totalorder %s39_s13, %s1195_s22  ;;  %p1201_p7 = scmp.lt.s32.totalorder %s1195_s22, %s1195_s22 }
  0x2d   :  { %p1202_p8 = por %p1201_p7, %p1200_p6 }
  0x2f   :  { %p1203_p9 = pnand %p1202_p8, %p1196_p5 }
  0x31   :  { %1206 = shalt.err (!%p1203_p9)
}
  0x32   :  { %s1262_s0 = smov 384   ;;  %s1263_s18 = smov 24  }
  0x33   :  { %44 = dma.hbm_to_vmem [thread:$0]  %s1382_s2, 24576, %s39_s13, [#allocation6], %s1262_s0, %s1262_s0, %s1263_s18  }
  0x34   :  { %s1264_s25 = smov [#allocation8]   ;;  %s1207_s29 = scalar_lea.hbm %s1383_s3, 6144 }
  0x35   :  { %s50_s26 = sshll.u32 %s1264_s25, 4  ;;  %p1208_p10 = scmp.ne.s32.totalorder %s1383_s3, %s1207_s29  ;;  %s51_s26 = int_to_ptr.vmem [resolvable:$true] %s50_s26 }
  0x36   :  { %p1211_p11 = scmp.lt.u32.totalorder %s1207_s29, %s1383_s3 }
  0x38   :  { %p1213_p12 = pnand %p1211_p11, %p1208_p10 }
  0x3a   :  { %1216 = shalt.err (!%p1213_p12)
}
  0x3b   :  { %s1217_s8 = scalar_lea.vmem %s51_s26, 6144  ;;  %p1222_p0 = scmp.lt.s32.totalorder %s51_s26, %s51_s26 }
  0x3c   :  { %p1218_p13 = scmp.ne.s32.totalorder %s51_s26, %s1217_s8  ;;  %p1223_p1 = scmp.lt.s32.totalorder %s1217_s8, %s1217_s8 }
  0x3e   :  { %p1224_p2 = por %p1223_p1, %p1222_p0 }
  0x40   :  { %p1225_p3 = pnand %p1224_p2, %p1218_p13 }
  0x42   :  { %1228 = shalt.err (!%p1225_p3)
}
  0x43   :  { %56 = dma.hbm_to_vmem [thread:$0]  %s1383_s3, 6144, %s51_s26, [#allocation9], %s1262_s0, %s1262_s0, %s1263_s18  }
  0x44   :  { %1251 = dma.done.wait [#allocation3], 512  }
  0x45   :  { %1252 = vsyncadd [#allocation3], 4294966784 }
  0x46   :  { %1253 = dma.done.wait [#allocation6], 24704  }
  0x47   :  { %1254 = vsyncadd [#allocation6], 4294942592 }
  0x48   :  { %1255 = dma.done.wait [#allocation9], 6144  }
  0x49   :  { %1256 = vsyncadd [#allocation9], 4294961152  ;;  %v1265_v0 = vmov 0.0   ;;  %v267_v1 = vld [vmem:[#allocation8 + $0x8] sm:$0xff]  ;;  %v270_v2 = vld [vmem:[#allocation8 + $0x20] sm:$0xff]  ;;  %vm1267_vm0 = vmmov 0  }
  0x4a   :  { %378 = vmatprep.mubr.f32.mxu1 %v1265_v0  ;;  %v74_v3 = vld [vmem:[#allocation7 + $0x8] sm:$0xff]  ;;  %v879_v4 = vpack.c.bf16 %v270_v2, %v267_v1  ;;  %v77_v5 = vld [vmem:[#allocation7 + $0x20] sm:$0xff]  ;;  %v269_v7 = vld [vmem:[#allocation8 + $0x18] sm:$0xff]  ;;  %s1268_s3 = smov [#allocation10]  }
  0x4b   :  { %v266_v6 = vld [vmem:[#allocation8] sm:$0xff]  ;;  %v935_v8 = vpack.c.bf16 %v77_v5, %v74_v3  ;;  %v76_v11 = vld [vmem:[#allocation7 + $0x18] sm:$0xff]  ;;  %v276_v14 = vld [vmem:[#allocation8 + $0x50] sm:$0xff]  ;;  %s746_s10 = sshll.u32 %s1268_s3, 4  ;;  %s747_s10 = int_to_ptr.vmem [resolvable:$true] %s746_s10 }
  0x4c   :  { %v881_v9 = vpack.c.bf16 %v269_v7, %v266_v6  ;;  %v73_v10 = vld [vmem:[#allocation7] sm:$0xff]  ;;  %v273_v12 = vld [vmem:[#allocation8 + $0x38] sm:$0xff]  ;;  %880 = vmatprep.subr.bf16.mxu1 %v879_v4  ;;  %v83_v16 = vld [vmem:[#allocation7 + $0x50] sm:$0xff]  ;;  %s1229_s1 = scalar_lea.vmem %s747_s10, 384  ;;  %p1234_p5 = scmp.lt.s32.totalorder %s747_s10, %s747_s10 }
  0x4d   :  { %v937_v13 = vpack.c.bf16 %v76_v11, %v73_v10  ;;  %v80_v15 = vld [vmem:[#allocation7 + $0x38] sm:$0xff]  ;;  %936 = vmatprep.subr.bf16.mxu0 %v935_v8  ;;  %v883_v17 = vpack.c.bf16 %v276_v14, %v273_v12  ;;  %v272_v19 = vld [vmem:[#allocation8 + $0x30] sm:$0xff]  ;;  %v275_v20 = vld [vmem:[#allocation8 + $0x48] sm:$0xff]  ;;  %p1230_p4 = scmp.ne.s32.totalorder %s747_s10, %s1229_s1  ;;  %p1235_p6 = scmp.lt.s32.totalorder %s1229_s1, %s1229_s1 }
  0x4e   :  { %882 = vmatpush1.bf16.msra.mxu1 %v881_v9  ;;  %v939_v18 = vpack.c.bf16 %v83_v16, %v80_v15  ;;  %v79_v21 = vld [vmem:[#allocation7 + $0x30] sm:$0xff]  ;;  %v885_v22 = vpack.c.bf16 %v275_v20, %v272_v19  ;;  %v82_v23 = vld [vmem:[#allocation7 + $0x48] sm:$0xff]  ;;  %v282_v25 = vld [vmem:[#allocation8 + $0x80] sm:$0xff] }
  0x4f   :  { %938 = vmatpush1.bf16.msra.mxu0 %v937_v13  ;;  %v279_v24 = vld [vmem:[#allocation8 + $0x68] sm:$0xff]  ;;  %884 = vmatprep.subr.bf16.mxu1 %v883_v17  ;;  %v941_v26 = vpack.c.bf16 %v82_v23, %v79_v21  ;;  %v89_v29 = vld [vmem:[#allocation7 + $0x80] sm:$0xff]  ;;  %v281_v32 = vld [vmem:[#allocation8 + $0x78] sm:$0xff]  ;;  %p1236_p7 = por %p1235_p6, %p1234_p5 }
  0x50   :  { %940 = vmatprep.subr.bf16.mxu0 %v939_v18  ;;  %v887_v27 = vpack.c.bf16 %v282_v25, %v279_v24  ;;  %v86_v28 = vld [vmem:[#allocation7 + $0x68] sm:$0xff]  ;;  %v278_v30 = vld [vmem:[#allocation8 + $0x60] sm:$0xff]  ;;  %v88_v34 = vld [vmem:[#allocation7 + $0x78] sm:$0xff] }
  0x51   :  { %v943_v31 = vpack.c.bf16 %v89_v29, %v86_v28  ;;  %v85_v33 = vld [vmem:[#allocation7 + $0x60] sm:$0xff]  ;;  %v889_v35 = vpack.c.bf16 %v281_v32, %v278_v30  ;;  %v285_v36 = vld [vmem:[#allocation8 + $0x98] sm:$0xff]  ;;  %v288_v37 = vld [vmem:[#allocation8 + $0xb0] sm:$0xff]  ;;  %p1237_p8 = pnand %p1236_p7, %p1230_p4 }
  0x52   :  { %886 = vmatpush1.bf16.msra.mxu1 %v885_v22  ;;  %v92_v38 = vld [vmem:[#allocation7 + $0x98] sm:$0xff]  ;;  %v945_v39 = vpack.c.bf16 %v88_v34, %v85_v33  ;;  %v891_v40 = vpack.c.bf16 %v288_v37, %v285_v36  ;;  %v95_v41 = vld [vmem:[#allocation7 + $0xb0] sm:$0xff]  ;;  %v287_v43 = vld [vmem:[#allocation8 + $0xa8] sm:$0xff] }
  0x53   :  { %942 = vmatpush1.bf16.msra.mxu0 %v941_v26  ;;  %888 = vmatprep.subr.bf16.mxu1 %v887_v27  ;;  %v284_v42 = vld [vmem:[#allocation8 + $0x90] sm:$0xff]  ;;  %v947_v44 = vpack.c.bf16 %v95_v41, %v92_v38  ;;  %v94_v46 = vld [vmem:[#allocation7 + $0xa8] sm:$0xff]  ;;  %v294_v48 = vld [vmem:[#allocation8 + $0xe0] sm:$0xff] }
  0x54   :  { %944 = vmatprep.subr.bf16.mxu0 %v943_v31  ;;  %v91_v45 = vld [vmem:[#allocation7 + $0x90] sm:$0xff]  ;;  %v291_v47 = vld [vmem:[#allocation8 + $0xc8] sm:$0xff]  ;;  %v101_v50 = vld [vmem:[#allocation7 + $0xe0] sm:$0xff]  ;;  %v893_v51 = vpack.c.bf16 %v287_v43, %v284_v42 }
  0x55   :  { %v98_v49 = vld [vmem:[#allocation7 + $0xc8] sm:$0xff]  ;;  %v949_v52 = vpack.c.bf16 %v94_v46, %v91_v45  ;;  %v895_v53 = vpack.c.bf16 %v294_v48, %v291_v47  ;;  %v290_v54 = vld [vmem:[#allocation8 + $0xc0] sm:$0xff]  ;;  %v293_v55 = vld [vmem:[#allocation8 + $0xd8] sm:$0xff]  ;;  %v1266_v45 = vmov 0.0|0.0  }
  0x56   :  { %890 = vmatpush1.bf16.msra.mxu1 %v889_v35  ;;  %v97_v56 = vld [vmem:[#allocation7 + $0xc0] sm:$0xff]  ;;  %v951_v57 = vpack.c.bf16 %v101_v50, %v98_v49  ;;  %v100_v58 = vld [vmem:[#allocation7 + $0xd8] sm:$0xff]  ;;  %v300_v60 = vld [vmem:[#allocation8 + $0x110] sm:$0xff]  ;;  %v897_v63 = vpack.c.bf16 %v293_v55, %v290_v54 }
  0x57   :  { %946 = vmatpush1.bf16.msra.mxu0 %v945_v39  ;;  %892 = vmatprep.subr.bf16.mxu1 %v891_v40  ;;  %v297_v59 = vld [vmem:[#allocation8 + $0xf8] sm:$0xff]  ;;  %v107_v62 = vld [vmem:[#allocation7 + $0x110] sm:$0xff]  ;;  %v953_v1 = vpack.c.bf16 %v100_v58, %v97_v56  ;;  %v299_v4 = vld [vmem:[#allocation8 + $0x108] sm:$0xff] }
  0x58   :  { %948 = vmatprep.subr.bf16.mxu0 %v947_v44  ;;  %v104_v61 = vld [vmem:[#allocation7 + $0xf8] sm:$0xff]  ;;  %v899_v2 = vpack.c.bf16 %v300_v60, %v297_v59  ;;  %v296_v3 = vld [vmem:[#allocation8 + $0xf0] sm:$0xff]  ;;  %v106_v7 = vld [vmem:[#allocation7 + $0x108] sm:$0xff] }
  0x59   :  { %v103_v5 = vld [vmem:[#allocation7 + $0xf0] sm:$0xff]  ;;  %v955_v6 = vpack.c.bf16 %v107_v62, %v104_v61  ;;  %v303_v8 = vld [vmem:[#allocation8 + $0x128] sm:$0xff]  ;;  %v306_v9 = vld [vmem:[#allocation8 + $0x140] sm:$0xff]  ;;  %v901_v12 = vpack.c.bf16 %v299_v4, %v296_v3 }
  0x5a   :  { %894 = vmatpush1.bf16.msra.mxu1 %v893_v51  ;;  %v110_v10 = vld [vmem:[#allocation7 + $0x128] sm:$0xff]  ;;  %v113_v11 = vld [vmem:[#allocation7 + $0x140] sm:$0xff]  ;;  %v957_v13 = vpack.c.bf16 %v106_v7, %v103_v5  ;;  %v903_v14 = vpack.c.bf16 %v306_v9, %v303_v8  ;;  %v305_v16 = vld [vmem:[#allocation8 + $0x138] sm:$0xff] }
  0x5b   :  { %950 = vmatpush1.bf16.msra.mxu0 %v949_v52  ;;  %896 = vmatprep.subr.bf16.mxu1 %v895_v53  ;;  %v302_v15 = vld [vmem:[#allocation8 + $0x120] sm:$0xff]  ;;  %v959_v18 = vpack.c.bf16 %v113_v11, %v110_v10  ;;  %v112_v19 = vld [vmem:[#allocation7 + $0x138] sm:$0xff]  ;;  %v312_v21 = vld [vmem:[#allocation8 + $0x170] sm:$0xff] }
  0x5c   :  { %952 = vmatprep.subr.bf16.mxu0 %v951_v57  ;;  %v109_v17 = vld [vmem:[#allocation7 + $0x120] sm:$0xff]  ;;  %v309_v20 = vld [vmem:[#allocation8 + $0x158] sm:$0xff]  ;;  %v119_v23 = vld [vmem:[#allocation7 + $0x170] sm:$0xff]  ;;  %v905_v24 = vpack.c.bf16 %v305_v16, %v302_v15 }
  0x5d   :  { %v116_v22 = vld [vmem:[#allocation7 + $0x158] sm:$0xff]  ;;  %v961_v25 = vpack.c.bf16 %v112_v19, %v109_v17  ;;  %v907_v26 = vpack.c.bf16 %v312_v21, %v309_v20  ;;  %v308_v27 = vld [vmem:[#allocation8 + $0x150] sm:$0xff]  ;;  %v311_v28 = vld [vmem:[#allocation8 + $0x168] sm:$0xff] }
  0x5e   :  { %898 = vmatpush1.bf16.msra.mxu1 %v897_v63  ;;  %v963_v29 = vpack.c.bf16 %v119_v23, %v116_v22  ;;  %v115_v30 = vld [vmem:[#allocation7 + $0x150] sm:$0xff]  ;;  %v118_v31 = vld [vmem:[#allocation7 + $0x168] sm:$0xff]  ;;  %v125_v33 = vld [vmem:[#allocation7 + $0x1a0] sm:$0xff]  ;;  %v909_v34 = vpack.c.bf16 %v311_v28, %v308_v27 }
  0x5f   :  { %954 = vmatpush1.bf16.msra.mxu0 %v953_v1  ;;  %900 = vmatprep.subr.bf16.mxu1 %v899_v2  ;;  %v122_v32 = vld [vmem:[#allocation7 + $0x188] sm:$0xff]  ;;  %v965_v35 = vpack.c.bf16 %v118_v31, %v115_v30  ;;  %v268_v36 = vld [vmem:[#allocation8 + $0x10] sm:$0xff]  ;;  %v121_v39 = vld [vmem:[#allocation7 + $0x180] sm:$0xff] }
  0x60   :  { %956 = vmatprep.subr.bf16.mxu0 %v955_v6  ;;  %v271_v37 = vld [vmem:[#allocation8 + $0x28] sm:$0xff]  ;;  %v967_v38 = vpack.c.bf16 %v125_v33, %v122_v32  ;;  %v124_v40 = vld [vmem:[#allocation7 + $0x198] sm:$0xff]  ;;  %v131_v42 = vld [vmem:[#allocation7 + $0x1d0] sm:$0xff] }
  0x61   :  { %v128_v41 = vld [vmem:[#allocation7 + $0x1b8] sm:$0xff]  ;;  %v912_v44 = vpack.c.bf16 %v271_v37, %v268_v36  ;;  %v969_v46 = vpack.c.bf16 %v124_v40, %v121_v39  ;;  %v274_v47 = vld [vmem:[#allocation8 + $0x40] sm:$0xff]  ;;  %v127_v50 = vld [vmem:[#allocation7 + $0x1b0] sm:$0xff] }
  0x62   :  { %902 = vmatpush1.bf16.msra.mxu1 %v901_v12  ;;  %v1343_v43 = vld [vmem:[#allocation5] sm:$0xff]  ;;  %v971_v49 = vpack.c.bf16 %v131_v42, %v128_v41  ;;  %v130_v51 = vld [vmem:[#allocation7 + $0x1c8] sm:$0xff]  ;;  %v137_v53 = vld [vmem:[#allocation7 + $0x200] sm:$0xff] }
  0x63   :  { %958 = vmatpush1.bf16.msra.mxu0 %v957_v13  ;;  %904 = vmatprep.subr.bf16.mxu1 %v903_v14  ;;  %v277_v48 = vld [vmem:[#allocation8 + $0x58] sm:$0xff]  ;;  %v134_v52 = vld [vmem:[#allocation7 + $0x1e8] sm:$0xff]  ;;  %v973_v55 = vpack.c.bf16 %v130_v51, %v127_v50  ;;  %v280_v56 = vld [vmem:[#allocation8 + $0x70] sm:$0xff] }
  0x64   :  { %960 = vmatprep.subr.bf16.mxu0 %v959_v18  ;;  %v915_v54 = vpack.c.bf16 %v277_v48, %v274_v47  ;;  %v283_v57 = vld [vmem:[#allocation8 + $0x88] sm:$0xff]  ;;  %v1349_v58 = vld [vmem:[#allocation2 + $0x8] sm:$0xff]  ;;  %v975_v59 = vpack.c.bf16 %v137_v53, %v134_v52  ;;  %v136_v61 = vld [vmem:[#allocation7 + $0x1f8] sm:$0xff] }
  0x65   :  { %v133_v60 = vld [vmem:[#allocation7 + $0x1e0] sm:$0xff]  ;;  %519 = vmatprep.mubr.f32.mxu0 %v1349_v58  ;;  %v140_v62 = vld [vmem:[#allocation7 + $0x218] sm:$0xff]  ;;  %v143_v63 = vld [vmem:[#allocation7 + $0x230] sm:$0xff]  ;;  %v918_v1 = vpack.c.bf16 %v283_v57, %v280_v56 }
  0x66   :  { %906 = vmatpush1.bf16.msra.mxu1 %v905_v24  ;;  %v286_v2 = vld [vmem:[#allocation8 + $0xa0] sm:$0xff]  ;;  %v289_v3 = vld [vmem:[#allocation8 + $0xb8] sm:$0xff]  ;;  %v979_v4 = vpack.c.bf16 %v143_v63, %v140_v62  ;;  %v139_v5 = vld [vmem:[#allocation7 + $0x210] sm:$0xff] }
  0x67   :  { %962 = vmatpush1.bf16.msra.mxu0 %v961_v25  ;;  %908 = vmatprep.subr.bf16.mxu1 %v907_v26  ;;  %v142_v6 = vld [vmem:[#allocation7 + $0x228] sm:$0xff]  ;;  %v149_v8 = vld [vmem:[#allocation7 + $0x260] sm:$0xff]  ;;  %v921_v9 = vpack.c.bf16 %v289_v3, %v286_v2  ;;  %v292_v11 = vld [vmem:[#allocation8 + $0xd0] sm:$0xff] }
  0x68   :  { %964 = vmatprep.subr.bf16.mxu0 %v963_v29  ;;  %v146_v7 = vld [vmem:[#allocation7 + $0x248] sm:$0xff]  ;;  %v981_v10 = vpack.c.bf16 %v142_v6, %v139_v5  ;;  %v145_v14 = vld [vmem:[#allocation7 + $0x240] sm:$0xff]  ;;  %v148_v15 = vld [vmem:[#allocation7 + $0x258] sm:$0xff] }
  0x69   :  { %v295_v12 = vld [vmem:[#allocation8 + $0xe8] sm:$0xff]  ;;  %v983_v13 = vpack.c.bf16 %v149_v8, %v146_v7  ;;  %v152_v16 = vld [vmem:[#allocation7 + $0x278] sm:$0xff]  ;;  %v155_v17 = vld [vmem:[#allocation7 + $0x290] sm:$0xff]  ;;  %v985_v19 = vpack.c.bf16 %v148_v15, %v145_v14 }
  0x6a   :  { %910 = vmatpush1.bf16.msra.mxu1 %v909_v34  ;;  %v924_v18 = vpack.c.bf16 %v295_v12, %v292_v11  ;;  %v298_v20 = vld [vmem:[#allocation8 + $0x100] sm:$0xff]  ;;  %v301_v21 = vld [vmem:[#allocation8 + $0x118] sm:$0xff]  ;;  %v987_v22 = vpack.c.bf16 %v155_v17, %v152_v16  ;;  %v151_v23 = vld [vmem:[#allocation7 + $0x270] sm:$0xff] }
  0x6b   :  { %966 = vmatpush1.bf16.msra.mxu0 %v965_v35  ;;  %911 = vmatprep.subr.bf16.mxu1 %v1266_v45  ;;  %v154_v24 = vld [vmem:[#allocation7 + $0x288] sm:$0xff]  ;;  %v161_v26 = vld [vmem:[#allocation7 + $0x2c0] sm:$0xff]  ;;  %v927_v27 = vpack.c.bf16 %v301_v21, %v298_v20  ;;  %v304_v29 = vld [vmem:[#allocation8 + $0x130] sm:$0xff] }
  0x6c   :  { %968 = vmatprep.subr.bf16.mxu0 %v967_v38  ;;  %v158_v25 = vld [vmem:[#allocation7 + $0x2a8] sm:$0xff]  ;;  %v989_v28 = vpack.c.bf16 %v154_v24, %v151_v23  ;;  %v157_v32 = vld [vmem:[#allocation7 + $0x2a0] sm:$0xff]  ;;  %v160_v33 = vld [vmem:[#allocation7 + $0x2b8] sm:$0xff] }
  0x6d   :  { %379 = vmatmul.mubr.f32.vlgmr.msra.gmra.mrb[0].mxu1 %v1343_v43  ;;  %v307_v30 = vld [vmem:[#allocation8 + $0x148] sm:$0xff]  ;;  %v991_v31 = vpack.c.bf16 %v161_v26, %v158_v25  ;;  %v164_v34 = vld [vmem:[#allocation7 + $0x2d8] sm:$0xff]  ;;  %v167_v35 = vld [vmem:[#allocation7 + $0x2f0] sm:$0xff]  ;;  %v993_v37 = vpack.c.bf16 %v160_v33, %v157_v32 }
  0x6e   :  { %913 = vmatpush3.bf16.msra.mxu1 %v912_v44  ;;  %876 = vmatprep.mubr.msk.f32.mxu1 %vm1267_vm0, %v1265_v0  ;;  %v977_v0 = vpack.c.bf16 %v136_v61, %v133_v60  ;;  %v930_v36 = vpack.c.bf16 %v307_v30, %v304_v29  ;;  %v310_v38 = vld [vmem:[#allocation8 + $0x160] sm:$0xff]  ;;  %v313_v39 = vld [vmem:[#allocation8 + $0x178] sm:$0xff]  ;;  %v163_v40 = vld [vmem:[#allocation7 + $0x2d0] sm:$0xff]  ;;  %v995_v41 = vpack.c.bf16 %v167_v35, %v164_v34 }
  0x6f   :  { %970 = vmatpush1.bf16.msra.mxu0 %v969_v46  ;;  %914 = vmatprep.subr.bf16.mxu1 %v1266_v45  ;;  %v166_v42 = vld [vmem:[#allocation7 + $0x2e8] sm:$0xff]  ;;  %v123_v44 = vld [vmem:[#allocation7 + $0x190] sm:$0xff]  ;;  %v173_v48 = vld [vmem:[#allocation7 + $0x320] sm:$0xff] }
  0x70   :  { %972 = vmatprep.subr.bf16.mxu0 %v971_v49  ;;  %v126_v46 = vld [vmem:[#allocation7 + $0x1a8] sm:$0xff]  ;;  %v933_v49 = vpack.c.bf16 %v313_v39, %v310_v38  ;;  %v997_v50 = vpack.c.bf16 %v166_v42, %v163_v40  ;;  %v169_v52 = vld [vmem:[#allocation7 + $0x300] sm:$0xff]  ;;  %v75_v53 = vld [vmem:[#allocation7 + $0x10] sm:$0xff] }
  0x71   :  { %v170_v47 = vld [vmem:[#allocation7 + $0x308] sm:$0xff]  ;;  %v1063_v51 = vpack.c.bf16 %v126_v46, %v123_v44  ;;  %v172_v56 = vld [vmem:[#allocation7 + $0x318] sm:$0xff]  ;;  %v129_v57 = vld [vmem:[#allocation7 + $0x1c0] sm:$0xff] }
  0x72   :  { %916 = vmatpush3.bf16.msra.mxu1 %v915_v54  ;;  %v78_v54 = vld [vmem:[#allocation7 + $0x28] sm:$0xff]  ;;  %v176_v60 = vld [vmem:[#allocation7 + $0x338] sm:$0xff]  ;;  %v179_v61 = vld [vmem:[#allocation7 + $0x350] sm:$0xff] }
  0x73   :  { %974 = vmatpush1.bf16.msra.mxu0 %v973_v55  ;;  %917 = vmatprep.subr.bf16.mxu1 %v1266_v45  ;;  %v999_v55 = vpack.c.bf16 %v173_v48, %v170_v47  ;;  %v1358_v62 = vld [vmem:[#allocation2] sm:$0xff]  ;;  %v1065_v63 = vpack.c.bf16 %v78_v54, %v75_v53  ;;  %v81_v2 = vld [vmem:[#allocation7 + $0x40] sm:$0xff]  ;;  %v178_v5 = vld [vmem:[#allocation7 + $0x348] sm:$0xff] }
  0x74   :  { %976 = vmatprep.subr.bf16.mxu0 %v975_v59  ;;  %v132_v59 = vld [vmem:[#allocation7 + $0x1d8] sm:$0xff]  ;;  %v135_v6 = vld [vmem:[#allocation7 + $0x1f0] sm:$0xff]  ;;  %v138_v7 = vld [vmem:[#allocation7 + $0x208] sm:$0xff] }
  0x75   :  { %v84_v3 = vld [vmem:[#allocation7 + $0x58] sm:$0xff]  ;;  %v182_v8 = vld [vmem:[#allocation7 + $0x368] sm:$0xff]  ;;  %v1071_v12 = vpack.c.bf16 %v138_v7, %v135_v6  ;;  %v87_v14 = vld [vmem:[#allocation7 + $0x70] sm:$0xff] }
  0x76   :  { %919 = vmatpush3.bf16.msra.mxu1 %v918_v1  ;;  %v1001_v1 = vpack.c.bf16 %v172_v56, %v169_v52  ;;  %v90_v15 = vld [vmem:[#allocation7 + $0x88] sm:$0xff]  ;;  %v184_v17 = vld [vmem:[#allocation7 + $0x378] sm:$0xff]  ;;  %v191_v20 = vld [vmem:[#allocation7 + $0x3b0] sm:$0xff] }
  0x77   :  { %978 = vmatpush1.bf16.msra.mxu0 %v977_v0  ;;  %920 = vmatprep.subr.bf16.mxu1 %v1266_v45  ;;  %v175_v0 = vld [vmem:[#allocation7 + $0x330] sm:$0xff]  ;;  %v1073_v21 = vpack.c.bf16 %v90_v15, %v87_v14  ;;  %v93_v25 = vld [vmem:[#allocation7 + $0xa0] sm:$0xff]  ;;  %v96_v26 = vld [vmem:[#allocation7 + $0xb8] sm:$0xff] }
  0x78   :  { %980 = vmatprep.subr.bf16.mxu0 %v979_v4  ;;  %v1003_v4 = vpack.c.bf16 %v179_v61, %v176_v60  ;;  %v1005_v11 = vpack.c.bf16 %v178_v5, %v175_v0  ;;  %v187_v24 = vld [vmem:[#allocation7 + $0x390] sm:$0xff]  ;;  %v150_v30 = vld [vmem:[#allocation7 + $0x268] sm:$0xff]  ;;  %v197_v32 = vld [vmem:[#allocation7 + $0x3e0] sm:$0xff] }
  0x79   :  { %v147_v29 = vld [vmem:[#allocation7 + $0x250] sm:$0xff]  ;;  %v193_v35 = vld [vmem:[#allocation7 + $0x3c0] sm:$0xff]  ;;  %v196_v39 = vld [vmem:[#allocation7 + $0x3d8] sm:$0xff] }
  0x7a   :  { %922 = vmatpush3.bf16.msra.mxu1 %v921_v9  ;;  %v185_v9 = vld [vmem:[#allocation7 + $0x380] sm:$0xff]  ;;  %v1079_v34 = vpack.c.bf16 %v150_v30, %v147_v29  ;;  %v200_v42 = vld [vmem:[#allocation7 + $0x3f8] sm:$0xff]  ;;  %v203_v44 = vld [vmem:[#allocation7 + $0x410] sm:$0xff]  ;;  %v1017_v48 = vpack.c.bf16 %v196_v39, %v193_v35 }
  0x7b   :  { %982 = vmatpush1.bf16.msra.mxu0 %v981_v10  ;;  %923 = vmatprep.subr.bf16.mxu1 %v1266_v45  ;;  %v1069_v10 = vpack.c.bf16 %v84_v3, %v81_v2  ;;  %v1007_v16 = vpack.c.bf16 %v185_v9, %v182_v8  ;;  %v153_v40 = vld [vmem:[#allocation7 + $0x280] sm:$0xff]  ;;  %v199_v47 = vld [vmem:[#allocation7 + $0x3f0] sm:$0xff]  ;;  %v1019_v53 = vpack.c.bf16 %v203_v44, %v200_v42  ;;  %v202_v54 = vld [vmem:[#allocation7 + $0x408] sm:$0xff] }
  0x7c   :  { %984 = vmatprep.subr.bf16.mxu0 %v983_v13  ;;  %v181_v13 = vld [vmem:[#allocation7 + $0x360] sm:$0xff]  ;;  %v1363_v52 = vld [vmem:[#allocation2 + $0x18] sm:$0xff]  ;;  %v162_v56 = vld [vmem:[#allocation7 + $0x2c8] sm:$0xff]  ;;  %v1021_v61 = vpack.c.bf16 %v202_v54, %v199_v47 }
  0x7d   :  { %v114_v0 = vld [vmem:[#allocation7 + $0x148] sm:$0xff]  ;;  %v208_v3 = vld [vmem:[#allocation7 + $0x438] sm:$0xff]  ;;  %v215_v7 = vld [vmem:[#allocation7 + $0x470] sm:$0xff] }
  0x7e   :  { %925 = vmatpush3.bf16.msra.mxu1 %v924_v18  ;;  %v141_v18 = vld [vmem:[#allocation7 + $0x220] sm:$0xff]  ;;  %v168_v5 = vld [vmem:[#allocation7 + $0x2f8] sm:$0xff]  ;;  %v214_v15 = vld [vmem:[#allocation7 + $0x468] sm:$0xff] }
  0x7f   :  { %986 = vmatpush1.bf16.msra.mxu0 %v985_v19  ;;  %926 = vmatprep.subr.bf16.mxu1 %v1266_v45  ;;  %v144_v19 = vld [vmem:[#allocation7 + $0x238] sm:$0xff]  ;;  %v227_v30 = vld [vmem:[#allocation7 + $0x4d0] sm:$0xff]  ;;  %v234_v39 = vld [vmem:[#allocation7 + $0x508] sm:$0xff] }
  0x80   :  { %988 = vmatprep.subr.bf16.mxu0 %v987_v22  ;;  %v1009_v22 = vpack.c.bf16 %v184_v17, %v181_v13  ;;  %v1075_v23 = vpack.c.bf16 %v144_v19, %v141_v18  ;;  %v212_v6 = vld [vmem:[#allocation7 + $0x458] sm:$0xff]  ;;  %v222_v17 = vld [vmem:[#allocation7 + $0x4a8] sm:$0xff]  ;;  %v221_v19 = vld [vmem:[#allocation7 + $0x4a0] sm:$0xff] }
  0x81   :  { %v120_v13 = vld [vmem:[#allocation7 + $0x178] sm:$0xff]  ;;  %v1027_v14 = vpack.c.bf16 %v215_v7, %v212_v6  ;;  %v218_v18 = vld [vmem:[#allocation7 + $0x488] sm:$0xff]  ;;  %v229_v47 = vld [vmem:[#allocation7 + $0x4e0] sm:$0xff] }
  0x82   :  { %928 = vmatpush3.bf16.msra.mxu1 %v927_v27  ;;  %v224_v29 = vld [vmem:[#allocation7 + $0x4b8] sm:$0xff]  ;;  %v241_v7 = vld [vmem:[#allocation7 + $0x540] sm:$0xff] }
  0x83   :  { %990 = vmatpush1.bf16.msra.mxu0 %v989_v28  ;;  %929 = vmatprep.subr.bf16.mxu1 %v1266_v45  ;;  %v190_v28 = vld [vmem:[#allocation7 + $0x3a8] sm:$0xff]  ;;  %v180_v35 = vld [vmem:[#allocation7 + $0x358] sm:$0xff] }
  0x84   :  { %992 = vmatprep.subr.bf16.mxu0 %v991_v31  ;;  %v194_v31 = vld [vmem:[#allocation7 + $0x3c8] sm:$0xff]  ;;  %v1013_v33 = vpack.c.bf16 %v190_v28, %v187_v24  ;;  %v228_v28 = vld [vmem:[#allocation7 + $0x4d8] sm:$0xff] }
  0x85   :  { %v1015_v38 = vpack.c.bf16 %v197_v32, %v194_v31  ;;  %v174_v24 = vld [vmem:[#allocation7 + $0x328] sm:$0xff]  ;;  %v240_v54 = vld [vmem:[#allocation7 + $0x538] sm:$0xff] }
  0x86   :  { %931 = vmatpush3.bf16.msra.mxu1 %v930_v36  ;;  %v99_v36 = vld [vmem:[#allocation7 + $0xd0] sm:$0xff] }
  0x87   :  { %994 = vmatpush1.bf16.msra.mxu0 %v993_v37  ;;  %932 = vmatprep.subr.bf16.mxu1 %v1266_v45  ;;  %v1067_v45 = vpack.c.bf16 %v132_v59, %v129_v57  ;;  %v102_v37 = vld [vmem:[#allocation7 + $0xe8] sm:$0xff]  ;;  %v209_v59 = vld [vmem:[#allocation7 + $0x440] sm:$0xff] }
  0x88   :  { %996 = vmatprep.subr.bf16.mxu0 %v995_v41  ;;  %v156_v41 = vld [vmem:[#allocation7 + $0x298] sm:$0xff]  ;;  %v1081_v46 = vpack.c.bf16 %v102_v37, %v99_v36  ;;  %v206_v57 = vld [vmem:[#allocation7 + $0x428] sm:$0xff]  ;;  %v1035_v36 = vpack.c.bf16 %v227_v30, %v224_v29  ;;  %v253_v30 = vld [vmem:[#allocation7 + $0x5a0] sm:$0xff] }
  0x89   :  { %v1023_v2 = vpack.c.bf16 %v209_v59, %v206_v57  ;;  %v226_v37 = vld [vmem:[#allocation7 + $0x4c8] sm:$0xff]  ;;  %v235_v59 = vld [vmem:[#allocation7 + $0x510] sm:$0xff] }
  0x8a   :  { %934 = vmatpush3.bf16.msra.mxu1 %v933_v49  ;;  %v1083_v49 = vpack.c.bf16 %v156_v41, %v153_v40  ;;  %v230_v40 = vld [vmem:[#allocation7 + $0x4e8] sm:$0xff]  ;;  %v233_v41 = vld [vmem:[#allocation7 + $0x500] sm:$0xff] }
  0x8b   :  { %998 = vmatpush1.bf16.msra.mxu0 %v997_v50  ;;  %1064 = vmatprep.subr.bf16.mxu1 %v1063_v51  ;;  %v105_v50 = vld [vmem:[#allocation7 + $0x100] sm:$0xff]  ;;  %v108_v51 = vld [vmem:[#allocation7 + $0x118] sm:$0xff] }
  0x8c   :  { %1000 = vmatprep.subr.bf16.mxu0 %v999_v55  ;;  %v159_v55 = vld [vmem:[#allocation7 + $0x2b0] sm:$0xff]  ;;  %v1085_v60 = vpack.c.bf16 %v108_v51, %v105_v50  ;;  %v1039_v50 = vpack.c.bf16 %v233_v41, %v230_v40  ;;  %v232_v51 = vld [vmem:[#allocation7 + $0x4f8] sm:$0xff]  ;;  %v213_v41 = vld [vmem:[#allocation7 + $0x460] sm:$0xff] }
  0x8d   :  { %877 = vmatmul.mubr.f32.vlgmr.msra.gmra.mrb[2].mxu1 %v1343_v43  ;;  %v188_v43 = vld [vmem:[#allocation7 + $0x398] sm:$0xff]  ;;  %v1041_v57 = vpack.c.bf16 %v232_v51, %v229_v47  ;;  %v262_v47 = vld [vmem:[#allocation7 + $0x5e8] sm:$0xff] }
  0x8e   :  { %520 = vmatmul.mubr.f32.vlgmr.msra.gmra.mrb[0].mxu0 %v1358_v62  ;;  %1066 = vmatpush3.bf16.msra.mxu1 %v1065_v63  ;;  %v1011_v27 = vpack.c.bf16 %v191_v20, %v188_v43  ;;  %v1087_v63 = vpack.c.bf16 %v162_v56, %v159_v55  ;;  %v236_v55 = vld [vmem:[#allocation7 + $0x518] sm:$0xff] }
  0x8f   :  { %1002 = vmatpush1.bf16.msra.mxu0 %v1001_v1  ;;  %1068 = vmatprep.subr.bf16.mxu1 %v1067_v45  ;;  %v205_v1 = vld [vmem:[#allocation7 + $0x420] sm:$0xff]  ;;  %v111_v45 = vld [vmem:[#allocation7 + $0x130] sm:$0xff] }
  0x90   :  { %1004 = vmatprep.subr.bf16.mxu0 %v1003_v4  ;;  %661 = vmatprep.mubr.f32.mxu1 %v1349_v58  ;;  %v1077_v58 = vpack.c.bf16 %v96_v26, %v93_v25  ;;  %v165_v4 = vld [vmem:[#allocation7 + $0x2e0] sm:$0xff]  ;;  %v1089_v8 = vpack.c.bf16 %v114_v0, %v111_v45  ;;  %v1025_v9 = vpack.c.bf16 %v208_v3, %v205_v1  ;;  %v220_v26 = vld [vmem:[#allocation7 + $0x498] sm:$0xff]  ;;  %v238_v1 = vld [vmem:[#allocation7 + $0x528] sm:$0xff] }
  0x91   :  { %590 = vmatprep.mubr.f32.mxu0 %v1363_v52  ;;  %v1031_v25 = vpack.c.bf16 %v221_v19, %v218_v18  ;;  %v243_v45 = vld [vmem:[#allocation7 + $0x550] sm:$0xff]  ;;  %v246_v0 = vld [vmem:[#allocation7 + $0x568] sm:$0xff]  ;;  %v245_v3 = vld [vmem:[#allocation7 + $0x560] sm:$0xff] }
  0x92   :  { %1070 = vmatpush3.bf16.msra.mxu1 %v1069_v10  ;;  %v1091_v10 = vpack.c.bf16 %v168_v5, %v165_v4  ;;  %v1045_v5 = vpack.c.bf16 %v238_v1, %v235_v59  ;;  %v1111_v6 = vpack.c.bf16 %v246_v0, %v243_v45  ;;  %v247_v19 = vld [vmem:[#allocation7 + $0x570] sm:$0xff] }
  0x93   :  { %1006 = vmatpush1.bf16.msra.mxu0 %v1005_v11  ;;  %1072 = vmatprep.subr.bf16.mxu1 %v1071_v12  ;;  %v211_v11 = vld [vmem:[#allocation7 + $0x450] sm:$0xff]  ;;  %v117_v12 = vld [vmem:[#allocation7 + $0x160] sm:$0xff] }
  0x94   :  { %1008 = vmatprep.subr.bf16.mxu0 %v1007_v16  ;;  %v219_v16 = vld [vmem:[#allocation7 + $0x490] sm:$0xff]  ;;  %v1093_v43 = vpack.c.bf16 %v120_v13, %v117_v12  ;;  %v1029_v20 = vpack.c.bf16 %v214_v15, %v211_v11  ;;  %v244_v11 = vld [vmem:[#allocation7 + $0x558] sm:$0xff]  ;;  %v249_v12 = vld [vmem:[#allocation7 + $0x580] sm:$0xff] }
  0x95   :  { %v252_v13 = vld [vmem:[#allocation7 + $0x598] sm:$0xff]  ;;  %v251_v15 = vld [vmem:[#allocation7 + $0x590] sm:$0xff] }
  0x96   :  { %1074 = vmatpush3.bf16.msra.mxu1 %v1073_v21  ;;  %v1095_v21 = vpack.c.bf16 %v222_v17, %v219_v16  ;;  %v1049_v17 = vpack.c.bf16 %v244_v11, %v241_v7  ;;  %v1115_v18 = vpack.c.bf16 %v252_v13, %v249_v12 }
  0x97   :  { %1010 = vmatpush1.bf16.msra.mxu0 %v1009_v22  ;;  %1076 = vmatprep.subr.bf16.mxu1 %v1075_v23  ;;  %v217_v22 = vld [vmem:[#allocation7 + $0x480] sm:$0xff]  ;;  %v171_v23 = vld [vmem:[#allocation7 + $0x310] sm:$0xff] }
  0x98   :  { %1012 = vmatprep.subr.bf16.mxu0 %v1011_v27  ;;  %v225_v27 = vld [vmem:[#allocation7 + $0x4c0] sm:$0xff]  ;;  %v1097_v31 = vpack.c.bf16 %v174_v24, %v171_v23  ;;  %v1033_v32 = vpack.c.bf16 %v220_v26, %v217_v22  ;;  %v250_v22 = vld [vmem:[#allocation7 + $0x588] sm:$0xff]  ;;  %v255_v23 = vld [vmem:[#allocation7 + $0x5b0] sm:$0xff] }
  0x99   :  { %v258_v24 = vld [vmem:[#allocation7 + $0x5c8] sm:$0xff]  ;;  %v257_v26 = vld [vmem:[#allocation7 + $0x5c0] sm:$0xff] }
  0x9a   :  { %1078 = vmatpush3.bf16.msra.mxu1 %v1077_v58  ;;  %v1099_v58 = vpack.c.bf16 %v228_v28, %v225_v27  ;;  %v1053_v28 = vpack.c.bf16 %v250_v22, %v247_v19  ;;  %v1119_v29 = vpack.c.bf16 %v258_v24, %v255_v23 }
  0x9b   :  { %1014 = vmatpush1.bf16.msra.mxu0 %v1013_v33  ;;  %1080 = vmatprep.subr.bf16.mxu1 %v1079_v34  ;;  %v223_v33 = vld [vmem:[#allocation7 + $0x4b0] sm:$0xff]  ;;  %v177_v34 = vld [vmem:[#allocation7 + $0x340] sm:$0xff] }
  0x9c   :  { %1016 = vmatprep.subr.bf16.mxu0 %v1015_v38  ;;  %v231_v38 = vld [vmem:[#allocation7 + $0x4f0] sm:$0xff]  ;;  %v1101_v42 = vpack.c.bf16 %v180_v35, %v177_v34  ;;  %v1037_v44 = vpack.c.bf16 %v226_v37, %v223_v33  ;;  %v256_v33 = vld [vmem:[#allocation7 + $0x5b8] sm:$0xff]  ;;  %v261_v34 = vld [vmem:[#allocation7 + $0x5e0] sm:$0xff] }
  0x9d   :  { %v264_v35 = vld [vmem:[#allocation7 + $0x5f8] sm:$0xff]  ;;  %v263_v37 = vld [vmem:[#allocation7 + $0x5f0] sm:$0xff] }
  0x9e   :  { %1082 = vmatpush3.bf16.msra.mxu1 %v1081_v46  ;;  %v1103_v46 = vpack.c.bf16 %v234_v39, %v231_v38  ;;  %v1057_v39 = vpack.c.bf16 %v256_v33, %v253_v30  ;;  %v1123_v40 = vpack.c.bf16 %v264_v35, %v261_v34 }
  0x9f   :  { %1018 = vmatpush1.bf16.msra.mxu0 %v1017_v48  ;;  %1084 = vmatprep.subr.bf16.mxu1 %v1083_v49  ;;  %v183_v48 = vld [vmem:[#allocation7 + $0x370] sm:$0xff]  ;;  %v186_v49 = vld [vmem:[#allocation7 + $0x388] sm:$0xff] }
  0xa0   :  { %1020 = vmatprep.subr.bf16.mxu0 %v1019_v53  ;;  %v237_v53 = vld [vmem:[#allocation7 + $0x520] sm:$0xff]  ;;  %v1105_v56 = vpack.c.bf16 %v186_v49, %v183_v48 }
  0xa2   :  { %1086 = vmatpush3.bf16.msra.mxu1 %v1085_v60  ;;  %v189_v60 = vld [vmem:[#allocation7 + $0x3a0] sm:$0xff] }
  0xa3   :  { %1022 = vmatpush1.bf16.msra.mxu0 %v1021_v61  ;;  %1088 = vmatprep.subr.bf16.mxu1 %v1087_v63  ;;  %v192_v61 = vld [vmem:[#allocation7 + $0x3b8] sm:$0xff] }
  0xa4   :  { %1024 = vmatprep.subr.bf16.mxu0 %v1023_v2  ;;  %v242_v2 = vld [vmem:[#allocation7 + $0x548] sm:$0xff]  ;;  %v1109_v4 = vpack.c.bf16 %v192_v61, %v189_v60 }
  0xa6   :  { %1090 = vmatpush3.bf16.msra.mxu1 %v1089_v8  ;;  %v195_v8 = vld [vmem:[#allocation7 + $0x3d0] sm:$0xff] }
  0xa7   :  { %1026 = vmatpush1.bf16.msra.mxu0 %v1025_v9  ;;  %1092 = vmatprep.subr.bf16.mxu1 %v1091_v10  ;;  %v198_v9 = vld [vmem:[#allocation7 + $0x3e8] sm:$0xff]  ;;  %v1047_v10 = vpack.c.bf16 %v245_v3, %v242_v2 }
  0xa8   :  { %1028 = vmatprep.subr.bf16.mxu0 %v1027_v14  ;;  %v248_v14 = vld [vmem:[#allocation7 + $0x578] sm:$0xff]  ;;  %v1113_v16 = vpack.c.bf16 %v198_v9, %v195_v8 }
  0xaa   :  { %1094 = vmatpush3.bf16.msra.mxu1 %v1093_v43  ;;  %v201_v43 = vld [vmem:[#allocation7 + $0x400] sm:$0xff] }
  0xab   :  { %1030 = vmatpush1.bf16.msra.mxu0 %v1029_v20  ;;  %1096 = vmatprep.subr.bf16.mxu1 %v1095_v21  ;;  %v204_v20 = vld [vmem:[#allocation7 + $0x418] sm:$0xff]  ;;  %v1051_v21 = vpack.c.bf16 %v251_v15, %v248_v14 }
  0xac   :  { %1032 = vmatprep.subr.bf16.mxu0 %v1031_v25  ;;  %v254_v25 = vld [vmem:[#allocation7 + $0x5a8] sm:$0xff]  ;;  %v1117_v27 = vpack.c.bf16 %v204_v20, %v201_v43 }
  0xad   :  { %662 = vmatmul.mubr.f32.vlgmr.msra.gmra.mrb[4].mxu1 %v1358_v62  ;;  %v239_v62 = vld [vmem:[#allocation7 + $0x530] sm:$0xff] }
  0xae   :  { %1098 = vmatpush3.bf16.msra.mxu1 %v1097_v31  ;;  %731 = vmatprep.mubr.f32.mxu1 %v1363_v52  ;;  %v1107_v52 = vpack.c.bf16 %v240_v54, %v237_v53  ;;  %v1043_v63 = vpack.c.bf16 %v239_v62, %v236_v55  ;;  %v207_v31 = vld [vmem:[#allocation7 + $0x430] sm:$0xff] }
  0xaf   :  { %1034 = vmatpush1.bf16.msra.mxu0 %v1033_v32  ;;  %1100 = vmatprep.subr.bf16.mxu1 %v1099_v58  ;;  %v210_v32 = vld [vmem:[#allocation7 + $0x448] sm:$0xff]  ;;  %v1055_v58 = vpack.c.bf16 %v257_v26, %v254_v25 }
  0xb0   :  { %1036 = vmatprep.subr.bf16.mxu0 %v1035_v36  ;;  %v260_v36 = vld [vmem:[#allocation7 + $0x5d8] sm:$0xff]  ;;  %v1121_v38 = vpack.c.bf16 %v210_v32, %v207_v31 }
  0xb2   :  { %1102 = vmatpush3.bf16.msra.mxu1 %v1101_v42  ;;  %v216_v42 = vld [vmem:[#allocation7 + $0x478] sm:$0xff] }
  0xb3   :  { %1038 = vmatpush1.bf16.msra.mxu0 %v1037_v44  ;;  %1104 = vmatprep.subr.bf16.mxu1 %v1103_v46  ;;  %v1059_v44 = vpack.c.bf16 %v263_v37, %v260_v36  ;;  %v259_v46 = vld [vmem:[#allocation7 + $0x5d0] sm:$0xff]  ;;  %v1125_v48 = vpack.c.bf16 %v216_v42, %v213_v41 }
  0xb4   :  { %1040 = vmatprep.subr.bf16.mxu0 %v1039_v50  ;;  %v1061_v49 = vpack.c.bf16 %v262_v47, %v259_v46  ;;  %v71_v50 = vld [vmem:[#allocation2 + $0x10] sm:$0xff] }
  0xb6   :  { %1106 = vmatpush3.bf16.msra.mxu1 %v1105_v56 }
  0xb7   :  { %1042 = vmatpush1.bf16.msra.mxu0 %v1041_v57  ;;  %1108 = vmatprep.subr.bf16.mxu1 %v1107_v52 }
  0xb8   :  { %1044 = vmatprep.subr.bf16.mxu0 %v1043_v63 }
  0xba   :  { %1110 = vmatpush3.bf16.msra.mxu1 %v1109_v4 }
  0xbb   :  { %1046 = vmatpush1.bf16.msra.mxu0 %v1045_v5  ;;  %1112 = vmatprep.subr.bf16.mxu1 %v1111_v6 }
  0xbc   :  { %1048 = vmatprep.subr.bf16.mxu0 %v1047_v10 }
  0xbe   :  { %1114 = vmatpush3.bf16.msra.mxu1 %v1113_v16 }
  0xbf   :  { %1050 = vmatpush1.bf16.msra.mxu0 %v1049_v17  ;;  %1116 = vmatprep.subr.bf16.mxu1 %v1115_v18 }
  0xc0   :  { %1052 = vmatprep.subr.bf16.mxu0 %v1051_v21 }
  0xc2   :  { %1118 = vmatpush3.bf16.msra.mxu1 %v1117_v27 }
  0xc3   :  { %1054 = vmatpush1.bf16.msra.mxu0 %v1053_v28  ;;  %1120 = vmatprep.subr.bf16.mxu1 %v1119_v29 }
  0xc4   :  { %1056 = vmatprep.subr.bf16.mxu0 %v1055_v58 }
  0xc6   :  { %1122 = vmatpush3.bf16.msra.mxu1 %v1121_v38 }
  0xc7   :  { %1058 = vmatpush1.bf16.msra.mxu0 %v1057_v39  ;;  %1124 = vmatprep.subr.bf16.mxu1 %v1123_v40 }
  0xc8   :  { %1060 = vmatprep.subr.bf16.mxu0 %v1059_v44 }
  0xca   :  { %1126 = vmatpush3.bf16.msra.mxu1 %v1125_v48 }
  0xcb   :  { %1062 = vmatpush1.bf16.msra.mxu0 %v1061_v49 }
  0xcd   :  { %732 = vmatmul.mubr.f32.vlgmr.msra.gmra.mrb[6].mxu1 %v71_v50 }
  0xce   :  { %591 = vmatmul.mubr.f32.vlgmr.msra.gmra.mrb[0].mxu0 %v71_v50 }
 0x140   :  { %v380_v51 = vpop.f32.mrb[0].mxu1 }
 0x141   :  { %v382_v53 = vpop.f32.mrb[1].mxu1 }
 0x160   :  { %v451_v54 = vpop.f32.mrb[2].mxu1 }
 0x161   :  { %v878_v55 = vpop.f32.mrb[3].mxu1 }
 0x180   :  { %v806_v62 = vpop.f32.mrb[4].mxu1 }
 0x181   :  { %v807_v56 = vpop.f32.mrb[5].mxu1 }
 0x182   :  { %v808_v57 = vadd.f32 %v807_v56, %v806_v62 }
 0x184   :  { %v664_v52 = vadd.f32 %v808_v57, %v451_v54 }
 0x1a0   :  { %v841_v59 = vpop.f32.mrb[6].mxu1 }
 0x1a1   :  { %v592_v60 = vpop.f32.mrb[0].mxu0  ;;  %v842_v61 = vpop.f32.mrb[7].mxu1 }
 0x1a2   :  { %v1127_v63 = vadd.f32 %v592_v60, %v380_v51  ;;  %v594_v1 = vpop.f32.mrb[1].mxu0  ;;  %v843_v45 = vadd.f32 %v842_v61, %v841_v59 }
 0x1a3   :  { %v1128_v0 = vadd.f32 %v594_v1, %v382_v53 }
 0x1a4   :  { %737 = vst [vmem:[#allocation10] sm:$0xff] %v1127_v63  ;;  %v734_v2 = vadd.f32 %v843_v45, %v664_v52 }
 0x1a5   :  { %738 = vst [vmem:[#allocation10 + $0x8] sm:$0xff] %v1128_v0 }
 0x1a6   :  { %739 = vst [vmem:[#allocation10 + $0x10] sm:$0xff] %v734_v2 }
 0x1a7   :  { %1240 = shalt.err (!%p1237_p8)
}
 0x1a8   :  { %s1241_s13 = scalar_lea.hbm %s1384_s4, 384 }
 0x1a9   :  { %p1242_p9 = scmp.ne.s32.totalorder %s1384_s4, %s1241_s13  ;;  %p1245_p10 = scmp.lt.u32.totalorder %s1241_s13, %s1384_s4 }
 0x1ab   :  { %p1247_p11 = pnand %p1245_p10, %p1242_p9 }
 0x1ad   :  { %1250 = shalt.err (!%p1247_p11)
}
 0x1ae   :  { %749 = dma.vmem_to_hbm [thread:$0]  %s747_s10, 384, %s1384_s4, [#allocation4]  }
 0x1af   :  { %1257 = dma.done.wait [#allocation4], 384  }
 0x1b0   :  { %1258 = vsyncadd [#allocation4], 4294966912 }
 0x1b1   :  { %753 = vsyncpa [#allocation3], 1 }
 0x1b2   :  { %754 = vsyncpa [#allocation6], 1 }
 0x1b3   :  { %755 = vsyncpa [#allocation9], 1 }
 0x1b4   :  { %756 = vsyncpa [#allocation4], 1 }

</bundles_post_ra>
